<compile_context>
chip_gen: v6e
topology: v6e:2x2x1
jax: 0.10.0
libtpu: 0.0.40
codegen_flags: <defaults>
</compile_context>

<pallas_src>
import functools

import jax
import jax.numpy as jnp
from jax import lax
from jax.experimental import pallas as pl
from jax.experimental.pallas import tpu as pltpu


def _flash_sdpa_kernel(q_ref, k_ref, v_ref, mask_ref, o_ref,
                       m_sc, l_sc, acc_sc, *, inv_temperature):
    # Grid: (batch, q-tile, kv-tile). Refs (batch dim squeezed):
    #   q_ref (bq, D), k_ref (bk, D), v_ref (bk, Dv), mask_ref (bq, bk), o_ref (bq, Dv)
    kv = pl.program_id(2)

    @pl.when(kv == 0)
    def _():
        m_sc[...] = jnp.full_like(m_sc, -jnp.inf)
        l_sc[...] = jnp.zeros_like(l_sc)
        acc_sc[...] = jnp.zeros_like(acc_sc)

    # Fold 1/temperature into the (bq, D) q tile (q's native dtype) rather than
    # scaling the (bq, bk) score matrix each kv step.
    q = q_ref[...] * inv_temperature
    k = k_ref[...]
    m = mask_ref[...]

    # q @ k^T without an explicit transpose: contract the last dim of both operands.
    s = lax.dot_general(q, k, (((1,), (1,)), ((), ())),
                        preferred_element_type=jnp.float32)       # (bq, bk) f32
    s = jnp.where(m == 0, jnp.float32(-1000000000.0), s)

    # Online (flash) softmax update.
    m_prev = m_sc[...]
    m_new = jnp.maximum(m_prev, jnp.max(s, axis=-1, keepdims=True))
    alpha = jnp.exp(m_prev - m_new)
    p = jnp.exp(s - m_new)

    l_sc[...] = alpha * l_sc[...] + jnp.sum(p, axis=-1, keepdims=True)
    acc_sc[...] = alpha * acc_sc[...] + jnp.dot(
        p.astype(v_ref.dtype), v_ref[...], preferred_element_type=jnp.float32)
    m_sc[...] = m_new

    @pl.when(kv == pl.num_programs(2) - 1)
    def _():
        # Exact divide: finalize runs once per q-tile, approx reciprocal buys nothing.
        o_ref[...] = (acc_sc[...] / l_sc[...]).astype(o_ref.dtype)


def _round_up(x, m):
    return ((x + m - 1) // m) * m


def _choose_tiling(length, cap, align=128):
    """Return (block, padded_length).

    If the whole axis fits one tile (<= cap) use the full extent (no padding, always
    layout-legal). Otherwise pad to a multiple of `align` and pick the largest
    `align`-multiple block <= cap that divides the padded length (128 always works),
    keeping VMEM bounded for any sequence length.
    """
    if length <= cap:
        return length, length
    padded = _round_up(length, align)
    block = align
    b = (cap // align) * align
    while b >= align:
        if padded % b == 0:
            block = b
            break
        b -= align
    return block, padded


def _pad_axis(x, axis, target):
    if x.shape[axis] == target:
        return x
    pad = [(0, 0)] * x.ndim
    pad[axis] = (0, target - x.shape[axis])
    return jnp.pad(x, pad)


def scaled_dot_product_attention(q, k, v, mask, *, temperature, dropout=0.0):
    """Pallas TPU implementation of ScaledDotProductAttention_hyper.forward (eval mode)."""
    del dropout  # identity at inference time
    B, Lq, D = q.shape
    _, Lk, Dv = v.shape
    assert k.shape == (B, Lk, D)
    assert mask is not None and mask.shape == (B, Lq, Lk)

    # Tile selection: large q tiles (fewer K/V re-reads, amortized per-step overhead),
    # 128-aligned tiling with zero-padding instead of full-extent fallback.
    block_q, Lq_pad = _choose_tiling(Lq, cap=512, align=128)
    block_k, Lk_pad = _choose_tiling(Lk, cap=512, align=128)

    # Keep at least 2 parallel grid units so both v7x TensorCores get work.
    if (B * (Lq_pad // block_q) < 2 and block_q % 16 == 0
            and Lq_pad % (block_q // 2) == 0):
        block_q //= 2

    # Zero-pad to the tiling. Padded keys carry mask == 0 -> score -1e9 -> exp -> 0,
    # padded query rows are sliced off after the call.
    q_p = _pad_axis(q, 1, Lq_pad)
    k_p = _pad_axis(k, 1, Lk_pad)
    v_p = _pad_axis(v, 1, Lk_pad)
    mask_p = _pad_axis(_pad_axis(mask, 2, Lk_pad), 1, Lq_pad)

    grid = (B, Lq_pad // block_q, Lk_pad // block_k)
    kernel = functools.partial(_flash_sdpa_kernel,
                               inv_temperature=1.0 / float(temperature))

    grid_spec = pltpu.PrefetchScalarGridSpec(
        num_scalar_prefetch=0,
        grid=grid,
        in_specs=[
            pl.BlockSpec((None, block_q, D), lambda b, i, j: (b, i, 0)),
            pl.BlockSpec((None, block_k, D), lambda b, i, j: (b, j, 0)),
            pl.BlockSpec((None, block_k, Dv), lambda b, i, j: (b, j, 0)),
            pl.BlockSpec((None, block_q, block_k), lambda b, i, j: (b, i, j)),
        ],
        # Same output block for every j -> VMEM-resident across the reduction axis.
        out_specs=pl.BlockSpec((None, block_q, Dv), lambda b, i, j: (b, i, 0)),
        scratch_shapes=[
            pltpu.VMEM((block_q, 1), jnp.float32),    # running max m
            pltpu.VMEM((block_q, 1), jnp.float32),    # running denom l
            pltpu.VMEM((block_q, Dv), jnp.float32),   # running output acc
        ],
    )

    itemsize = q.dtype.itemsize
    # Explicit VMEM budget derived from the chosen tiles (double-buffered ins/outs,
    # f32 scratch, generous allowance for f32 score/prob temporaries).
    tile_bytes = (
        2 * (block_q * D * itemsize
             + block_k * D * k.dtype.itemsize
             + block_k * Dv * v.dtype.itemsize
             + block_q * block_k * mask.dtype.itemsize
             + block_q * Dv * itemsize)
        + block_q * (2 + Dv) * 4
        + 4 * block_q * block_k * 4)
    vmem_limit = int(min(64 << 20, max(3 * tile_bytes, 16 << 20)))

    bytes_accessed = (q_p.size * itemsize
                      + k_p.size * k.dtype.itemsize
                      + v_p.size * v.dtype.itemsize
                      + mask_p.size * mask.dtype.itemsize
                      + B * Lq_pad * Dv * itemsize)
    cost = pl.CostEstimate(
        flops=2 * B * Lq_pad * Lk_pad * (D + Dv),
        transcendentals=B * Lq_pad * Lk_pad,
        bytes_accessed=bytes_accessed,
    )

    out = pl.pallas_call(
        kernel,
        out_shape=jax.ShapeDtypeStruct((B, Lq_pad, Dv), q.dtype),
        grid_spec=grid_spec,
        compiler_params=pltpu.CompilerParams(
            dimension_semantics=("parallel", "parallel", "arbitrary"),
            vmem_limit_bytes=vmem_limit),
        cost_estimate=cost,
    )(q_p, k_p, v_p, mask_p)

    if Lq_pad != Lq:
        out = out[:, :Lq, :]
    return out


def _reference(q, k, v, mask, temperature):
    attn = jnp.matmul(q / temperature, jnp.swapaxes(k, 1, 2))
    attn = jnp.where(mask == 0, -1000000000.0, attn)
    attn = jax.nn.softmax(attn, axis=-1)
    return jnp.matmul(attn, v)


if __name__ == "__main__":
    key = jax.random.PRNGKey(0)
    kq, kk, kv_key, km = jax.random.split(key, 4)

    # Small shapes consistent with the module's forward.
    B, Lq, Lk, D, Dv = 2, 8, 8, 32, 32
    temperature = float(D) ** 0.5

    q = jax.random.normal(kq, (B, Lq, D), dtype=jnp.float32)
    k = jax.random.normal(kk, (B, Lk, D), dtype=jnp.float32)
    v = jax.random.normal(kv_key, (B, Lk, Dv), dtype=jnp.float32)
    # Binary mask (1 = keep, 0 = masked out), each query keeps at least position 0.
    mask = (jax.random.uniform(km, (B, Lq, Lk)) > 0.3).astype(jnp.float32)
    mask = mask.at[:, :, 0].set(1.0)

    out = scaled_dot_product_attention(q, k, v, mask,
                                       temperature=temperature, dropout=0.1)
    out = jax.block_until_ready(out)
    ref = _reference(q, k, v, mask, temperature)
    assert out.shape == (B, Lq, Dv)
    assert jnp.allclose(out, ref, atol=1e-4, rtol=1e-4), "mismatch vs pure-JAX reference"

    # Also exercise the tiled + zero-padded path (Lk > 512 -> 128-aligned kv tiles).
    B2, Lq2, Lk2 = 2, 16, 600
    q2 = jax.random.normal(kq, (B2, Lq2, D), dtype=jnp.float32)
    k2 = jax.random.normal(kk, (B2, Lk2, D), dtype=jnp.float32)
    v2 = jax.random.normal(kv_key, (B2, Lk2, Dv), dtype=jnp.float32)
    m2 = (jax.random.uniform(km, (B2, Lq2, Lk2)) > 0.3).astype(jnp.float32)
    m2 = m2.at[:, :, 0].set(1.0)
    out2 = jax.block_until_ready(
        scaled_dot_product_attention(q2, k2, v2, m2, temperature=temperature))
    ref2 = _reference(q2, k2, v2, m2, temperature)
    assert out2.shape == (B2, Lq2, Dv)
    assert jnp.allclose(out2, ref2, atol=1e-4, rtol=1e-4), "mismatch on padded/tiled path"

    print("KERNEL_OK")
</pallas_src>

<mosaic_0001>
module attributes {stable_mosaic.version = 11 : i64} {
  func.func @_flash_sdpa_kernel(%arg0: i32, %arg1: i32, %arg2: i32, %arg3: memref<1x8x32xf32, #tpu.memory_space<vmem>>, %arg4: memref<1x8x32xf32, #tpu.memory_space<vmem>>, %arg5: memref<1x8x32xf32, #tpu.memory_space<vmem>>, %arg6: memref<1x8x8xf32, #tpu.memory_space<vmem>>, %arg7: memref<1x8x32xf32, #tpu.memory_space<vmem>>, %arg8: memref<8x1xf32, #tpu.memory_space<vmem>>, %arg9: memref<8x1xf32, #tpu.memory_space<vmem>>, %arg10: memref<8x32xf32, #tpu.memory_space<vmem>>) attributes {dimension_semantics = [#tpu.dimension_semantics<parallel>, #tpu.dimension_semantics<parallel>, #tpu.dimension_semantics<arbitrary>], iteration_bounds = array<i64: 2, 1, 1>, scalar_prefetch = 0 : i64, scratch_operands = 3 : i64, tpu.core_type = #tpu.core_type<tc>, window_params = [{transform_indices = @transform_0, window_bounds = array<i64: 1, 8, 32>}, {transform_indices = @transform_1, window_bounds = array<i64: 1, 8, 32>}, {transform_indices = @transform_2, window_bounds = array<i64: 1, 8, 32>}, {transform_indices = @transform_3, window_bounds = array<i64: 1, 8, 8>}, {transform_indices = @transform_4, window_bounds = array<i64: 1, 8, 32>}]} {
    %c0_i32 = arith.constant 0 : i32
    %0 = arith.cmpi eq, %arg2, %c0_i32 : i32
    %1 = arith.extui %0 : i1 to i32
    %c0_i32_0 = arith.constant 0 : i32
    %2 = arith.cmpi ne, %1, %c0_i32_0 : i32
    scf.if %2 {
      %cst_32 = arith.constant 0xFF800000 : f32
      %43 = vector.broadcast %cst_32 : f32 to vector<8x1xf32>
      %c0_33 = arith.constant 0 : index
      %c0_34 = arith.constant 0 : index
      %44 = vector.load %arg8[%c0_33, %c0_34] : memref<8x1xf32, #tpu.memory_space<vmem>>, vector<8x1xf32>
      tpu.vector_store %arg8[%c0_33, %c0_34], %43 {strides = array<i32>} : memref<8x1xf32, #tpu.memory_space<vmem>>, vector<8x1xf32>,
      %cst_35 = arith.constant 0.000000e+00 : f32
      %45 = vector.broadcast %cst_35 : f32 to vector<8x1xf32>
      %c0_36 = arith.constant 0 : index
      %c0_37 = arith.constant 0 : index
      %46 = vector.load %arg9[%c0_36, %c0_37] : memref<8x1xf32, #tpu.memory_space<vmem>>, vector<8x1xf32>
      tpu.vector_store %arg9[%c0_36, %c0_37], %45 {strides = array<i32>} : memref<8x1xf32, #tpu.memory_space<vmem>>, vector<8x1xf32>,
      %cst_38 = arith.constant 0.000000e+00 : f32
      %47 = vector.broadcast %cst_38 : f32 to vector<8x32xf32>
      %c0_39 = arith.constant 0 : index
      %c0_40 = arith.constant 0 : index
      %48 = vector.load %arg10[%c0_39, %c0_40] : memref<8x32xf32, #tpu.memory_space<vmem>>, vector<8x32xf32>
      tpu.vector_store %arg10[%c0_39, %c0_40], %47 {strides = array<i32>} : memref<8x32xf32, #tpu.memory_space<vmem>>, vector<8x32xf32>,
    } else {
    }
    %c0 = arith.constant 0 : index
    %c0_1 = arith.constant 0 : index
    %c0_2 = arith.constant 0 : index
    %3 = vector.load %arg3[%c0, %c0_1, %c0_2] : memref<1x8x32xf32, #tpu.memory_space<vmem>>, vector<1x8x32xf32>
    %4 = vector.shape_cast %3 : vector<1x8x32xf32> to vector<8x32xf32>
    %cst = arith.constant 0.176776692 : f32
    %5 = vector.broadcast %cst : f32 to vector<8x32xf32>
    %6 = arith.mulf %4, %5 : vector<8x32xf32>
    %c0_3 = arith.constant 0 : index
    %c0_4 = arith.constant 0 : index
    %c0_5 = arith.constant 0 : index
    %7 = vector.load %arg4[%c0_3, %c0_4, %c0_5] : memref<1x8x32xf32, #tpu.memory_space<vmem>>, vector<1x8x32xf32>
    %8 = vector.shape_cast %7 : vector<1x8x32xf32> to vector<8x32xf32>
    %c0_6 = arith.constant 0 : index
    %c0_7 = arith.constant 0 : index
    %c0_8 = arith.constant 0 : index
    %9 = vector.load %arg6[%c0_6, %c0_7, %c0_8] : memref<1x8x8xf32, #tpu.memory_space<vmem>>, vector<1x8x8xf32>
    %10 = vector.shape_cast %9 : vector<1x8x8xf32> to vector<8x8xf32>
    %cst_9 = arith.constant dense<0.000000e+00> : vector<8x8xf32>
    %11 = tpu.matmul %6, %8, %cst_9 {dimension_numbers = #tpu.dot_dimension_numbers<[1], [1], [0], [0], [0, 0, 1, 0], [], []>} : vector<8x32xf32>, vector<8x32xf32>, vector<8x8xf32> -> vector<8x8xf32>
    %cst_10 = arith.constant 0.000000e+00 : f32
    %12 = vector.broadcast %cst_10 : f32 to vector<8x8xf32>
    %13 = arith.cmpf oeq, %10, %12 : vector<8x8xf32>
    %cst_11 = arith.constant -1.000000e+09 : f32
    %14 = vector.broadcast %cst_11 : f32 to vector<8x8xf32>
    %15 = arith.select %13, %14, %11 : vector<8x8xi1>, vector<8x8xf32>
    %c0_12 = arith.constant 0 : index
    %c0_13 = arith.constant 0 : index
    %16 = vector.load %arg8[%c0_12, %c0_13] : memref<8x1xf32, #tpu.memory_space<vmem>>, vector<8x1xf32>
    %cst_14 = arith.constant dense<0xFF800000> : vector<8xf32>
    %17 = vector.multi_reduction <maximumf>, %15, %cst_14 [1] : vector<8x8xf32> to vector<8xf32>
    %18 = vector.shape_cast %17 : vector<8xf32> to vector<8x1xf32>
    %19 = arith.maximumf %16, %18 : vector<8x1xf32>
    %20 = arith.subf %16, %19 : vector<8x1xf32>
    %21 = math.exp %20 : vector<8x1xf32>
    %22 = vector.broadcast %19 : vector<8x1xf32> to vector<8x8xf32>
    %23 = arith.subf %15, %22 : vector<8x8xf32>
    %24 = math.exp %23 : vector<8x8xf32>
    %c0_15 = arith.constant 0 : index
    %c0_16 = arith.constant 0 : index
    %25 = vector.load %arg9[%c0_15, %c0_16] : memref<8x1xf32, #tpu.memory_space<vmem>>, vector<8x1xf32>
    %26 = arith.mulf %21, %25 : vector<8x1xf32>
    %cst_17 = arith.constant dense<0.000000e+00> : vector<8xf32>
    %27 = vector.multi_reduction <add>, %24, %cst_17 [1] : vector<8x8xf32> to vector<8xf32>
    %28 = vector.shape_cast %27 : vector<8xf32> to vector<8x1xf32>
    %29 = arith.addf %26, %28 : vector<8x1xf32>
    %c0_18 = arith.constant 0 : index
    %c0_19 = arith.constant 0 : index
    %30 = vector.load %arg9[%c0_18, %c0_19] : memref<8x1xf32, #tpu.memory_space<vmem>>, vector<8x1xf32>
    tpu.vector_store %arg9[%c0_18, %c0_19], %29 {strides = array<i32>} : memref<8x1xf32, #tpu.memory_space<vmem>>, vector<8x1xf32>,
    %c0_20 = arith.constant 0 : index
    %c0_21 = arith.constant 0 : index
    %31 = vector.load %arg10[%c0_20, %c0_21] : memref<8x32xf32, #tpu.memory_space<vmem>>, vector<8x32xf32>
    %32 = vector.broadcast %21 : vector<8x1xf32> to vector<8x32xf32>
    %33 = arith.mulf %32, %31 : vector<8x32xf32>
    %c0_22 = arith.constant 0 : index
    %c0_23 = arith.constant 0 : index
    %c0_24 = arith.constant 0 : index
    %34 = vector.load %arg5[%c0_22, %c0_23, %c0_24] : memref<1x8x32xf32, #tpu.memory_space<vmem>>, vector<1x8x32xf32>
    %35 = vector.shape_cast %34 : vector<1x8x32xf32> to vector<8x32xf32>
    %cst_25 = arith.constant dense<0.000000e+00> : vector<8x32xf32>
    %36 = tpu.matmul %24, %35, %cst_25 {dimension_numbers = #tpu.dot_dimension_numbers<[1], [0], [0], [1], [0, 0, 1, 1], [], []>} : vector<8x8xf32>, vector<8x32xf32>, vector<8x32xf32> -> vector<8x32xf32>
    %37 = arith.addf %33, %36 : vector<8x32xf32>
    %c0_26 = arith.constant 0 : index
    %c0_27 = arith.constant 0 : index
    %38 = vector.load %arg10[%c0_26, %c0_27] : memref<8x32xf32, #tpu.memory_space<vmem>>, vector<8x32xf32>
    tpu.vector_store %arg10[%c0_26, %c0_27], %37 {strides = array<i32>} : memref<8x32xf32, #tpu.memory_space<vmem>>, vector<8x32xf32>,
    %c0_28 = arith.constant 0 : index
    %c0_29 = arith.constant 0 : index
    %39 = vector.load %arg8[%c0_28, %c0_29] : memref<8x1xf32, #tpu.memory_space<vmem>>, vector<8x1xf32>
    tpu.vector_store %arg8[%c0_28, %c0_29], %19 {strides = array<i32>} : memref<8x1xf32, #tpu.memory_space<vmem>>, vector<8x1xf32>,
    %c0_i32_30 = arith.constant 0 : i32
    %40 = arith.cmpi eq, %arg2, %c0_i32_30 : i32
    %41 = arith.extui %40 : i1 to i32
    %c0_i32_31 = arith.constant 0 : i32
    %42 = arith.cmpi ne, %41, %c0_i32_31 : i32
    scf.if %42 {
      %c0_32 = arith.constant 0 : index
      %c0_33 = arith.constant 0 : index
      %43 = vector.load %arg10[%c0_32, %c0_33] : memref<8x32xf32, #tpu.memory_space<vmem>>, vector<8x32xf32>
      %c0_34 = arith.constant 0 : index
      %c0_35 = arith.constant 0 : index
      %44 = vector.load %arg9[%c0_34, %c0_35] : memref<8x1xf32, #tpu.memory_space<vmem>>, vector<8x1xf32>
      %45 = vector.broadcast %44 : vector<8x1xf32> to vector<8x32xf32>
      %46 = arith.divf %43, %45 : vector<8x32xf32>
      %c0_36 = arith.constant 0 : index
      %c0_37 = arith.constant 0 : index
      %c0_38 = arith.constant 0 : index
      %47 = vector.load %arg7[%c0_36, %c0_37, %c0_38] : memref<1x8x32xf32, #tpu.memory_space<vmem>>, vector<1x8x32xf32>
      %48 = vector.shape_cast %47 : vector<1x8x32xf32> to vector<8x32xf32>
      %49 = vector.shape_cast %46 : vector<8x32xf32> to vector<1x8x32xf32>
      tpu.vector_store %arg7[%c0_36, %c0_37, %c0_38], %49 {strides = array<i32>} : memref<1x8x32xf32, #tpu.memory_space<vmem>>, vector<1x8x32xf32>,
    } else {
    }
    return
  }
  func.func @transform_0(%arg0: i32, %arg1: i32, %arg2: i32) -> (i32, i32, i32) {
    %c0_i32 = arith.constant 0 : i32
    %c0_i32_0 = arith.constant 0 : i32
    return %arg0, %arg1, %c0_i32 : i32, i32, i32
  }
  func.func @transform_1(%arg0: i32, %arg1: i32, %arg2: i32) -> (i32, i32, i32) {
    %c0_i32 = arith.constant 0 : i32
    %c0_i32_0 = arith.constant 0 : i32
    return %arg0, %arg2, %c0_i32 : i32, i32, i32
  }
  func.func @transform_2(%arg0: i32, %arg1: i32, %arg2: i32) -> (i32, i32, i32) {
    %c0_i32 = arith.constant 0 : i32
    %c0_i32_0 = arith.constant 0 : i32
    return %arg0, %arg2, %c0_i32 : i32, i32, i32
  }
  func.func @transform_3(%arg0: i32, %arg1: i32, %arg2: i32) -> (i32, i32, i32) {
    %c0_i32 = arith.constant 0 : i32
    return %arg0, %arg1, %arg2 : i32, i32, i32
  }
  func.func @transform_4(%arg0: i32, %arg1: i32, %arg2: i32) -> (i32, i32, i32) {
    %c0_i32 = arith.constant 0 : i32
    %c0_i32_0 = arith.constant 0 : i32
    return %arg0, %arg1, %c0_i32 : i32, i32, i32
  }
}

</mosaic_0001>

<bundles_post_ra>
// kernel: tpu_custom_call.1
= control target key start
LH: loop header
LB: loop body
LE: loop exit
PB: predicated region body
PF: predicated region fallthrough
CT: control target
= control target key end

     0   :  { %s1332_s0 = inlined_call_operand.hbm [shape: f32[2,8,32], index: 0, kind: input, shape index: {}]   ;;  %s1333_s1 = inlined_call_operand.hbm [shape: f32[2,8,32], index: 1, kind: input, shape index: {}]   ;;  %s1334_s2 = inlined_call_operand.hbm [shape: f32[2,8,32], index: 2, kind: input, shape index: {}]   ;;  %s1335_s3 = inlined_call_operand.hbm [shape: f32[2,8,8], index: 3, kind: input, shape index: {}]   ;;  %s1336_s4 = inlined_call_operand.hbm [shape: f32[2,8,32], index: 4, kind: output, shape index: {}]  }
   0x1   :  { %1340 = sst [smem:[#allocation22_spill]] %s1333_s1 }
   0x2   :  { %9 = vsyncpa [#allocation6], 0 }
   0x3   :  { %11 = vsyncpa [#allocation6 + $0x1], 0 }
   0x4   :  { %12 = vsyncpa [#allocation9], 0 }
   0x5   :  { %14 = vsyncpa [#allocation9 + $0x1], 0 }
   0x6   :  { %15 = vsyncpa [#allocation12], 0 }
   0x7   :  { %17 = vsyncpa [#allocation12 + $0x1], 0 }
   0x8   :  { %18 = vsyncpa [#allocation7], 0 }
   0x9   :  { %20 = vsyncpa [#allocation7 + $0x1], 0  ;;  %s1103_s15 = smov 0   ;;  %s1105_s16 = smov 0  }
   0xa   :  { %s1107_s17 = smov 0   ;;  %s1109_s18 = smov 0  }
   0xb   :  { %s1111_s19 = smov 0   ;;  %s1113_s20 = smov 0  }
   0xc LB: > { %1341 = sst [smem:[#allocation18_spill]] %s1055_s17  ;;  %s1134_s21 = sadd.s32 4294967295, %s1067_s20   ;;  %s1067_s20 = sphi %s1113_s20, %s26_s20   ;;  %s1063_s19 = sphi %s1111_s19, %s1356_s19   ;;  %s1059_s18 = sphi %s1109_s18, %s1355_s18   ;;  %s1055_s17 = sphi %s1107_s17, %s1354_s17   ;;  %s1051_s16 = sphi %s1105_s16, %s1358_s16   ;;  %s1047_s15 = sphi %s1103_s15, %s1357_s15  }
   0xd   : > { %1342 = sst [smem:[#allocation19_spill]] %s1063_s19  ;;  %s740_s22 = sadd.s32 4294967294, %s1067_s20  }
   0xe   : > { %s45_s23 = sadd.s32 1, %s1063_s19  ;;  %s54_s24 = sadd.s32 1, %s1055_s17 }
   0xf   : > { %p47_p0 = scmp.ge.s32.totalorder %s45_s23, 2  ;;  %p61_p1 = scmp.ne.s32.totalorder %s1055_s17, %s1051_s16 }
  0x10   : > { %p62_p2 = scmp.eq.s32.totalorder %s1067_s20, 0  ;;  %p67_p3 = scmp.ne.s32.totalorder %s1051_s16, %s1047_s15 }
  0x11   : > { %s1360_s23 = smov (%p47_p0, %s45_s23), 0  ;;  %p68_p5 = scmp.eq.s32.totalorder %s1134_s21, 0 }
  0x12   : > { %1343 = sst [smem:[#allocation20_spill]] %s1360_s23  ;;  %p1146_p4 = por %p62_p2, %p61_p1 }
  0x13   : > { %s49_s26 = ssub.s32 %s1063_s19, %s1360_s23  ;;  %p179_p6 = scmp.eq.s32.totalorder %s1134_s21, 1 }
  0x14   : > { %p52_p7 = scmp.eq.s32.totalorder %s49_s26, 0  ;;  %p1154_p8 = por %p68_p5, %p67_p3 }
  0x15   : > { %p1158_p9 = por %p179_p6, %p61_p1  ;;  %p185_p10 = scmp.eq.s32.totalorder %s740_s22, 1 }
  0x16   : > { %s1163_s29 = scalar_select %p52_p7, %s1055_s17, %s54_s24  }
  0x17   : > { %p1165_p11 = por %p185_p10, %p67_p3  ;;  %p805_p13 = scmp.lt.s32.totalorder %s1067_s20, 2 }
  0x18   : > { %1347 = sst [smem:[#allocation21_spill]] %s1163_s29  ;;  %s1172_s5 = sand.u32 1, %s1055_s17  }
  0x19   : > { %s1175_s6 = sshll.u32 %s1172_s5, 3  ;;  %s1178_s7 = sshll.u32 %s1063_s19, 7 }
  0x1a   : > { %p1182_p0 = pnand %p805_p13, %p1146_p4  ;;  %s224_s9 = sand.u32 1, %s1067_s20  }
  0x1b   : > { %s1350_s1 = sld [smem:[#allocation22_spill]]  ;;  %s228_s13 = scalar_lea.vmem [#allocation8], %s1175_s6 }
  0x1c   : > { %s236_s14 = sshll.u32 %s228_s13, 4  ;;  %p751_p1 = scmp.ge.s32.totalorder %s1067_s20, 1  ;;  %s237_s14 = int_to_ptr.vmem [resolvable:$true] %s236_s14 }
  0x1d   : > { %p280_p2 = scmp.lt.s32.totalorder %s1067_s20, 3  ;;  %s1194_s22 = scalar_lea.sflag [#allocation9], %s224_s9 }
  0x1e   : > { %p869_p3 = pneg %p1182_p0  ;;  %s880_s24 = scalar_lea.vmem %s237_s14, 128 }
  0x1f   : > { %p881_p4 = scmp.ne.s32.totalorder %s237_s14, %s880_s24  ;;  %s1069_s25 = smov [#allocation8]  }
  0x20   : > { %s885_s26 = sshll.u32 %s1069_s25, 4  ;;  %s886_s26 = int_to_ptr.vmem [resolvable:$false] %s885_s26 }
  0x21   : > { %s234_s12 = scalar_lea.hbm %s1350_s1, %s1178_s7  ;;  %p883_p5 = pnand %p881_p4, %p869_p3 }
  0x22   : > { %s887_s10 = scalar_lea.vmem %s886_s26, 256  ;;  %p888_p7 = scmp.lt.s32.totalorder %s237_s14, %s886_s26 }
  0x23   : > { %p884_p6 = pneg %p883_p5  ;;  %p889_p10 = scmp.lt.s32.totalorder %s887_s10, %s880_s24 }
  0x25   : > { %p890_p13 = por %p889_p10, %p888_p7 }
  0x27   : > { %p891_p12 = pnand %p890_p13, %p884_p6 }
  0x29   : > { %894 = shalt.err (!%p891_p12)
}
  0x2a   : > { %794 = dma.hbm_to_vmem [thread:$0]  (!%p1182_p0), %s234_s12, 128, %s237_s14, %s1194_s22  }
  0x2b   : > { %p1208_p4 = pnand %p751_p1, %p280_p2  ;;  %s215_s24 = scalar_lea.hbm %s1332_s0, %s1178_s7 }
  0x2c   : > { %s209_s25 = scalar_lea.vmem [#allocation5], %s1175_s6  ;;  %s253_s23 = scalar_lea.hbm %s1334_s2, %s1178_s7 }
  0x2d   : > { %s217_s26 = sshll.u32 %s209_s25, 4  ;;  %s206_s19 = scalar_lea.sflag [#allocation6], %s1172_s5  ;;  %s218_s26 = int_to_ptr.vmem [resolvable:$true] %s217_s26 }
  0x2e   : > { %s908_s29 = scalar_lea.vmem %s218_s26, 128  ;;  %s1070_s12 = smov [#allocation5]  }
  0x2f   : > { %p909_p12 = scmp.ne.s32.totalorder %s218_s26, %s908_s29  ;;  %s913_s14 = sshll.u32 %s1070_s12, 4  ;;  %s914_s14 = int_to_ptr.vmem [resolvable:$false] %s913_s14 }
  0x30   : > { %s915_s17 = scalar_lea.vmem %s914_s14, 256  ;;  %p916_p5 = scmp.lt.s32.totalorder %s218_s26, %s914_s14 }
  0x31   : > { %p911_p1 = pnand %p909_p12, %p869_p3  ;;  %p917_p6 = scmp.lt.s32.totalorder %s915_s17, %s908_s29 }
  0x33   : > { %p912_p2 = pneg %p911_p1  ;;  %p918_p7 = por %p917_p6, %p916_p5 }
  0x35   : > { %p919_p10 = pnand %p918_p7, %p912_p2 }
  0x37   : > { %922 = shalt.err (!%p919_p10)
}
  0x38   : > { %791 = dma.hbm_to_vmem [thread:$0]  (!%p1182_p0), %s215_s24, 128, %s218_s26, %s206_s19  }
  0x39   : > { %s247_s1 = scalar_lea.vmem [#allocation10], %s1175_s6  ;;  %s1071_s25 = smov [#allocation10]  }
  0x3a   : > { %s255_s11 = sshll.u32 %s247_s1, 4  ;;  %s941_s10 = sshll.u32 %s1071_s25, 4  ;;  %s256_s11 = int_to_ptr.vmem [resolvable:$true] %s255_s11  ;;  %s942_s10 = int_to_ptr.vmem [resolvable:$false] %s941_s10 }
  0x3b   : > { %s936_s13 = scalar_lea.vmem %s256_s11, 128  ;;  %s943_s17 = scalar_lea.vmem %s942_s10, 256 }
  0x3c   : > { %p937_p13 = scmp.ne.s32.totalorder %s256_s11, %s936_s13  ;;  %p944_p2 = scmp.lt.s32.totalorder %s256_s11, %s942_s10 }
  0x3d   : > { %p945_p5 = scmp.lt.s32.totalorder %s943_s17, %s936_s13 }
  0x3e   : > { %p939_p12 = pnand %p937_p13, %p869_p3 }
  0x3f   : > { %p946_p6 = por %p945_p5, %p944_p2 }
  0x40   : > { %p940_p1 = pneg %p939_p12 }
  0x42   : > { %p947_p7 = pnand %p946_p6, %p940_p1 }
  0x44   : > { %950 = shalt.err (!%p947_p7)
}
  0x45   : > { %797 = dma.hbm_to_vmem [thread:$0]  (!%p1182_p0), %s253_s23, 128, %s256_s11, %s1194_s22  }
  0x46   : > { %s273_s12 = scalar_lea.hbm %s1335_s3, %s1178_s7  ;;  %s266_s14 = scalar_lea.vmem [#allocation11], %s1175_s6 }
  0x47   : > { %s275_s1 = sshll.u32 %s266_s14, 4  ;;  %s263_s13 = scalar_lea.sflag [#allocation12], %s1172_s5  ;;  %s276_s1 = int_to_ptr.vmem [resolvable:$true] %s275_s1 }
  0x48   : > { %s964_s25 = scalar_lea.vmem %s276_s1, 128  ;;  %s1072_s10 = smov [#allocation11]  }
  0x49   : > { %p965_p10 = scmp.ne.s32.totalorder %s276_s1, %s964_s25  ;;  %s969_s17 = sshll.u32 %s1072_s10, 4  ;;  %s970_s17 = int_to_ptr.vmem [resolvable:$false] %s969_s17 }
  0x4a   : > { %s971_s19 = scalar_lea.vmem %s970_s17, 256  ;;  %p972_p1 = scmp.lt.s32.totalorder %s276_s1, %s970_s17 }
  0x4b   : > { %p967_p13 = pnand %p965_p10, %p869_p3  ;;  %p973_p2 = scmp.lt.s32.totalorder %s971_s19, %s964_s25 }
  0x4d   : > { %p968_p12 = pneg %p967_p13  ;;  %p974_p5 = por %p973_p2, %p972_p1 }
  0x4f   : > { %p975_p6 = pnand %p974_p5, %p968_p12 }
  0x51   : > { %978 = shalt.err (!%p975_p6)
}
  0x52   : > { %800 = dma.hbm_to_vmem [thread:$0]  (!%p1182_p0), %s273_s12, 128, %s276_s1, %s263_s13  }
  0x53   : > { %284 = sbr.rel (%p1208_p4) target bundleno = 882 (0x372), region = 36  ;;  %s1253_s23 = sand.u32 (!%p1208_p4), 1, %s1051_s16  }
  0x54   : > { %s1256_s5 = sshll.u32 (!%p1208_p4), %s1253_s23, 3  ;;  %s287_s6 = scalar_lea.sflag (!%p1208_p4), [#allocation6], %s1253_s23 }
  0x55   : > { %s290_s7 = scalar_lea.vmem (!%p1208_p4), [#allocation5], %s1256_s5 }
  0x58   : > { %1030 = dma.done.wait (%p1154_p8), %s287_s6, 128  }
  0x59   : > { %1032 = vsyncadd (%p1154_p8), %s287_s6, 4294967168  ;;  %s295_s8 = sand.u32 1, %s1134_s21   ;;  %s299_s9 = scalar_lea.vmem [#allocation8], %s1256_s5 }
  0x5a   : > { %s296_s22 = scalar_lea.sflag [#allocation9], %s295_s8 }
  0x5b   : > { %1034 = dma.done.wait (%p1154_p8), %s296_s22, 256  }
  0x5c   : > { %1036 = vsyncadd (%p1154_p8), %s296_s22, 4294967040  ;;  %s308_s11 = scalar_lea.vmem [#allocation10], %s1256_s5  ;;  %s314_s29 = scalar_lea.sflag [#allocation12], %s1253_s23 }
  0x5d   : > { %s317_s24 = scalar_lea.vmem [#allocation11], %s1256_s5 }
  0x5e   : > { %1038 = dma.done.wait (%p1154_p8), %s314_s29, 128  }
  0x5f   : > { %1040 = vsyncadd (%p1154_p8), %s314_s29, 4294967168  ;;  %vm364_vm0 = vcmask 261120   ;;  %v1073_v0 = vmov 0.0   ;;  %vm1074_vm1 = vmmov 0   ;;  %v368_v1 = vld [vmem:[%s299_s9] sm:$0xff]  ;;  %v366_v2 = vld [vmem:[%s290_s7] sm:$0xff] }
  0x60   : > { %768 = vmatprep.subr.mxu0 %v1073_v0  ;;  %365 = vst.msk [vmem:[#allocation4] sm:$0xff] %vm364_vm0, %v1073_v0  ;;  %770 = vmatprep.mubr.msk.f32.mxu0 %vm1074_vm1, %v1073_v0  ;;  %v367_v3 = vmul.f32 0.17677669, %v366_v2  ;;  %vm361_vm2 = vcmask 7168   ;;  %v1075_v4 = vmov -inf   ;;  %v369_v5 = vld [vmem:[%s317_s24] sm:$0xff] }
  0x61   : > { %773 = vmatprep.subr.mxu1 %v1073_v0  ;;  %775 = vmatprep.mubr.msk.f32.mxu1 %vm1074_vm1, %v1073_v0  ;;  %362 = vst.msk [vmem:[#allocation2] sm:$0xff] %vm361_vm2, %v1075_v4  ;;  %363 = vst.msk [vmem:[#allocation3] sm:$0xff] %vm361_vm2, %v1073_v0  ;;  %vm447_vm3 = vcmp.eq.f32.partialorder %v369_v5, 0.0  ;;  %vm450_vm4 = vcmask 64512   ;;  %v1076_v10 = vmov 0   ;;  %v481_v15 = vld [vmem:[%s308_s11] sm:$0xff] }
  0x62   : > { %769 = vmatpush3.xpose.msk.msra.mxu0 %vm364_vm0, %v368_v1  ;;  %859 = vset.pattern.permute.xlu0 %v1076_v10  ;;  %s761_s21 = sshll.u32 %s1059_s18, 7  ;;  %s356_s27 = scalar_lea.vmem [#allocation13], %s1256_s5 }
  0x63   : > { %860 = vset.pattern.permute.xlu1 %v1076_v10  ;;  %774 = vmatpush3.msra.mxu1 %v481_v15  ;;  %s586_s26 = sshll.u32 %s356_s27, 4  ;;  %s584_s1 = scalar_lea.hbm %s1336_s4, %s761_s21  ;;  %s587_s26 = int_to_ptr.vmem [resolvable:$true] %s586_s26 }
  0x64   : > { %s572_s13 = scalar_lea.sflag [#allocation7], %s1253_s23  ;;  %s979_s25 = scalar_lea.vmem %s587_s26, 128 }
  0x65   : > { %771 = vmatmul.mubr.msk.f32.vlgmr.msra.gmra.mxu0 %vm364_vm0, %v367_v3  ;;  %p980_p8 = scmp.ne.s32.totalorder %s587_s26, %s979_s25  ;;  %s1077_s10 = smov [#allocation13]  }
  0x66   : > { %s983_s18 = sshll.u32 %s1077_s10, 4  ;;  %s984_s18 = int_to_ptr.vmem [resolvable:$false] %s983_s18 }
  0x67   : > { %v474_v31 = vld [vmem:[#allocation4] sm:$0xff]  ;;  %p981_p0 = pnand %p980_p8, %p1158_p9  ;;  %s985_s17 = scalar_lea.vmem %s984_s18, 256 }
  0x68   : > { %v449_v11 = vld [vmem:[#allocation2] sm:$0xff]  ;;  %v466_v23 = vld [vmem:[#allocation3] sm:$0xff]  ;;  %p986_p4 = scmp.lt.s32.totalorder %s587_s26, %s984_s18  ;;  %p987_p7 = scmp.lt.s32.totalorder %s985_s17, %s979_s25 }
  0x69   : > { %p982_p3 = pneg %p981_p0 }
  0x6a   : > { %p988_p10 = por %p987_p7, %p986_p4 }
  0x6c   : > { %p989_p13 = pnand %p988_p10, %p982_p3 }
 0x125   : > { %v443_v6 = vpop.f32.mrf.mxu0 }
 0x126   : > { %v448_v7 = vsel %vm447_vm3, -1e+09, %v443_v6 }
 0x127   : > { %v772_v8 = vpop.f32.mrf.mxu0  ;;  %v451_v9 = vsel %vm450_vm4, %v448_v7, -inf }
 0x128   : > { %452 = vmax.xlane.f32.xlu0 %v451_v9 }
 0x1b1   : > { %v453_v12 = vpop.xlane.xlu0 %452 }
 0x1b2   : > { %v454_v13 = vmax.f32 %v449_v11, %v453_v12 }
 0x1b4   : > { %v455_v14 = vsub.f32 %v449_v11, %v454_v13  ;;  %557 = vst.msk [vmem:[#allocation2] sm:$0xff] %vm361_vm2, %v454_v13  ;;  %460 = vperm.xlu0 %859, %v454_v13  }
 0x1b6   : > { %v456_v21 = vmul.f32 1.442695, %v455_v14 }
 0x22f   : > { %v461_v16 = vpop.permute.xlu0 %460 }
 0x230   : > { %v463_v17 = vsub.f32 %v448_v7, %v461_v16 }
 0x232   : > { %v464_v18 = vmul.f32 1.442695, %v463_v17 }
 0x234   : > { %861 = vpow2.f32 %v464_v18 }
 0x235   : > { %863 = vpow2.f32 %v456_v21 }
 0x241   : > { %v862_v19 = vpop.eup %861 }
 0x242   : > { %776 = vmatmul.mubr.msk.f32.vlgmr.msra.gmra.mxu1 %vm450_vm4, %v862_v19  ;;  %v468_v20 = vsel %vm450_vm4, %v862_v19, 0.0  ;;  %v864_v22 = vpop.eup %863 }
 0x243   : > { %469 = vadd.xlane.f32.xlu1 %v468_v20  ;;  %v467_v24 = vmul.f32 %v864_v22, %v466_v23 }
 0x2cc   : > { %v470_v25 = vpop.xlane.xlu1 %469 }
 0x2cd   : > { %v471_v26 = vadd.f32 %v470_v25, %v467_v24 }
 0x2cf   : > { %473 = vst.msk [vmem:[#allocation3] sm:$0xff] %vm361_vm2, %v471_v26 }
 0x2d6   : > { %v562_v27 = vld [vmem:[#allocation3] sm:$0xff] }
 0x2d7   : > { %565 = vperm.xlu1 %860, %v562_v27  }
 0x2db   : > { %477 = vperm.xlu1 %860, %v864_v22  }
 0x302   : > { %v551_v28 = vpop.f32.mrf.mxu1 }
 0x304   : > { %v777_v29 = vpop.f32.mrf.mxu1 }
 0x352   : > { %v566_v30 = vpop.permute.xlu1 %565 }
 0x353   : > { %865 = vrcp.f32 %v566_v30 }
 0x356   : > { %v478_v32 = vpop.permute.xlu1 %477 }
 0x357   : > { %v480_v33 = vmul.f32 %v478_v32, %v474_v31 }
 0x359   : > { %v555_v34 = vadd.f32 %v551_v28, %v480_v33 }
 0x35b   : > { %556 = vst.msk [vmem:[#allocation4] sm:$0xff] %vm364_vm0, %v555_v34 }
 0x360   : > { %v866_v35 = vpop.eup %865 }
 0x362   : > { %v561_v36 = vld [vmem:[#allocation4] sm:$0xff] }
 0x363   : > { %v569_v37 = vmul.f32 %v866_v35, %v561_v36 }
 0x365   : > { %570 = vst.msk [vmem:[%s356_s27] sm:$0xff] %vm364_vm0, %v569_v37 }
 0x366   : > { %992 = shalt.err (!%p989_p13)
}
 0x367   : > { %s993_s19 = scalar_lea.hbm %s584_s1, 128  ;;  %s997_s6 = scalar_lea.hbm %s1336_s4, 256 }
 0x368   : > { %p994_p12 = scmp.ne.s32.totalorder %s584_s1, %s993_s19  ;;  %p998_p5 = scmp.lt.s32.totalorder %s584_s1, %s1336_s4 }
 0x369   : > { %p999_p6 = scmp.lt.s32.totalorder %s997_s6, %s993_s19 }
 0x36a   : > { %p995_p1 = pnand %p994_p12, %p1158_p9 }
 0x36b   : > { %p1000_p8 = por %p999_p6, %p998_p5 }
 0x36c   : > { %p996_p2 = pneg %p995_p1 }
 0x36e   : > { %p1001_p0 = pnand %p1000_p8, %p996_p2 }
 0x370   : > { %1004 = shalt.err (!%p1001_p0)
}
 0x371   : > { %786 = dma.vmem_to_hbm [thread:$0]  (%p1158_p9), %s587_s26, 128, %s584_s1, %s572_s13  }
 0x372 PF: > { %s598_s22 = sand.u32 1, %s1047_s15   ;;  %p1352_p3 = scmp.ge.s32.totalorder %s1067_s20, 2 }
 0x373   : > { %s599_s9 = scalar_lea.sflag [#allocation7], %s598_s22 }
 0x374   : > { %p802_p4 = pnand %p1352_p3, %p1165_p11 }
 0x376   : > { %p803_p7 = pneg %p802_p4 }
 0x378   : > { %1042 = dma.done.wait (%p803_p7), %s599_s9, 128  }
 0x379   : > { %1044 = vsyncadd (%p803_p7), %s599_s9, 4294967168  ;;  %s26_s20 = sadd.s32 1, %s1067_s20   ;;  %s1353_s11 = sld [smem:[#allocation18_spill]] }
 0x37a   : > { %p23_p10 = scmp.ge.s32.totalorder %s26_s20, 4   ;;  %s1354_s17 = sld [smem:[#allocation21_spill]] }
 0x37b   : > { %s1355_s18 = sld [smem:[#allocation19_spill]]  ;;  %s1357_s15 = smov %s1051_s16 }
 0x37c   : > { %s1356_s19 = sld [smem:[#allocation20_spill]]  ;;  %25 = sbr.rel (!%p23_p10) target bundleno = 12 (0xc), region = 126 }
 0x37f   : > { %s1358_s16 = smov %s1353_s11 }
 0x381   :  { %604 = vsyncpa [#allocation6], 1 }
 0x382   :  { %606 = vsyncpa [#allocation6 + $0x1], 1 }
 0x383   :  { %607 = vsyncpa [#allocation9], 1 }
 0x384   :  { %609 = vsyncpa [#allocation9 + $0x1], 1 }
 0x385   :  { %610 = vsyncpa [#allocation12], 1 }
 0x386   :  { %612 = vsyncpa [#allocation12 + $0x1], 1 }
 0x387   :  { %613 = vsyncpa [#allocation7], 1 }
 0x388   :  { %615 = vsyncpa [#allocation7 + $0x1], 1 }

</bundles_post_ra>
